<compile_context>
chip_gen: v5e
topology: v5e:2x2
jax: 0.10.0
libtpu: 0.0.40
codegen_flags: <defaults>
</compile_context>

<pallas_src>
import functools

import jax
import jax.numpy as jnp
from jax.experimental import pallas as pl
from jax.experimental.pallas import tpu as pltpu


def _axis_mask_kernel(params_ref, x_ref, o_ref, *,
                      max_num_masks, fill_value, mask_axis):
    """One grid step = TILE_B flattened-batch rows.

    params_ref: VMEM (TILE_B, 1, 2*M) int32  ([:, :, :M]=starts, [:, :, M:]=widths)
    x_ref, o_ref: VMEM (TILE_B, T, F)
    """
    tb, t, f = x_ref.shape
    M = max_num_masks
    if mask_axis == 2:                      # mask along freq
        mshape = (tb, 1, f)
    else:                                   # mask along time
        mshape = (tb, t, 1)

    ref = jax.lax.broadcasted_iota(jnp.int32, mshape, mask_axis)
    p = params_ref[...]                     # (tb, 1, 2M)

    mask = jnp.zeros(mshape, dtype=jnp.bool_)
    for m in range(M):                      # small & static
        s = p[:, :, m][:, :, None]          # (tb, 1, 1) start
        w = p[:, :, M + m][:, :, None]      # (tb, 1, 1) width (>= 0)
        # single unsigned compare:  s <= ref < s + w
        mask = jnp.logical_or(
            mask, (ref - s).astype(jnp.uint32) < w.astype(jnp.uint32))

    x = x_ref[...]
    fill = jnp.asarray(fill_value, dtype=x.dtype)
    # mask broadcasts across T (freq masking) or F (time masking): a splat.
    o_ref[...] = jnp.where(mask, fill, x)


def _hw_block_config():
    """(target_block_bytes, vmem_limit_bytes) per TPU generation."""
    try:
        kind = jax.devices()[0].device_kind.lower()
    except Exception:
        kind = ""
    if "v7" in kind:
        # 64 MiB physical VMEM, ~3.2 TB/s HBM: bigger blocks, explicit budget.
        return 6 << 20, 48 << 20
    if "v6" in kind:
        # 128 MiB physical, 32 MiB default scoped.
        return 4 << 20, 64 << 20
    if "v5 lite" in kind or "v5e" in kind:
        # ~820 GB/s HBM, 16 MiB default scoped: 2 MiB blocks already <10% overhead.
        return 2 << 20, 32 << 20
    if "v5" in kind:  # v5p
        return 4 << 20, 64 << 20
    return 2 << 20, None


def _choose_tile_b(batch, row_bytes, target_block_bytes):
    """Row count per block: ~target bytes, but always >= 2 grid steps if B>1."""
    tile = max(1, min(batch, target_block_bytes // max(row_bytes, 1)))
    if batch > 1:
        tile = min(tile, pl.cdiv(batch, 2))
    return tile


def _axis_mask(x, params, *, mask_axis, fill_value, max_num_masks):
    """x: (B, T, F); params: (B, 1, 2*M) int32 (starts | widths)."""
    B, T, F = x.shape
    target_bytes, vmem_limit = _hw_block_config()
    row_bytes = T * F * jnp.dtype(x.dtype).itemsize
    tile_b = _choose_tile_b(B, row_bytes, target_bytes)
    grid = (pl.cdiv(B, tile_b),)            # ragged last block is fine
    M2 = 2 * max_num_masks

    kernel = functools.partial(
        _axis_mask_kernel,
        max_num_masks=max_num_masks,
        fill_value=fill_value,
        mask_axis=mask_axis,
    )
    return pl.pallas_call(
        kernel,
        out_shape=jax.ShapeDtypeStruct((B, T, F), x.dtype),
        grid=grid,
        in_specs=[
            # last-two dims of the param block equal the full array dims
            pl.BlockSpec((tile_b, 1, M2), lambda i: (i, 0, 0)),
            pl.BlockSpec((tile_b, T, F), lambda i: (i, 0, 0)),
        ],
        out_specs=pl.BlockSpec((tile_b, T, F), lambda i: (i, 0, 0)),
        compiler_params=pltpu.CompilerParams(
            dimension_semantics=("parallel",),
            vmem_limit_bytes=vmem_limit),
    )(params, x)


class AxisMasker:
    """JAX/Pallas port of hyperion AxisMasker (SpecAugment). Fully jit-able."""

    def __init__(self, min_width=0, max_width=30, min_num_masks=1,
                 max_num_masks=2, dim=-1, fill_value=0):
        assert min_width >= 0
        assert max_width > 0
        assert min_num_masks >= 0
        assert max_num_masks > 0
        assert dim in (-1, -2), "only dim=-1 (freq) or dim=-2 (time) supported"
        self.min_width = min_width
        self.max_width = max_width
        self.min_num_masks = min_num_masks
        self.max_num_masks = max_num_masks
        self.dim = dim
        self.fill_value = fill_value

    def __call__(self, key, x, training=True):
        if not training:
            return x, None

        in_shape = x.shape
        ndim = x.ndim
        if ndim > 3:
            x = x.reshape(-1, in_shape[-2], in_shape[-1])
        B, T, F = x.shape
        mask_axis = 2 if self.dim == -1 else 1
        masked_dim_length = F if mask_axis == 2 else T
        M = self.max_num_masks

        # ---- random parameters: traced, no host sync, static kernel shape ----
        key_n, key_w, key_s = jax.random.split(key, 3)
        # one num_masks per call, shared across rows (matches the PyTorch ref)
        num_masks = jax.random.randint(
            key_n, (), self.min_num_masks, self.max_num_masks + 1,
            dtype=jnp.int32)
        widths = jax.random.randint(
            key_w, (B, M), self.min_width, self.max_width + 1,
            dtype=jnp.int32)
        # unused mask slots (m >= num_masks) become width 0 -> no-op masks
        widths = jnp.where(jnp.arange(M, dtype=jnp.int32)[None, :] < num_masks,
                           widths, 0)
        # global max width across batch (matches the PyTorch reference)
        max_start = jnp.maximum(
            masked_dim_length - jnp.max(widths) + 1, 1)
        start_pos = jax.random.randint(
            key_s, (B, M), 0, max_start, dtype=jnp.int32)

        # pack [starts | widths] into one small VMEM input
        params = jnp.concatenate([start_pos, widths], axis=1)
        params = params.reshape(B, 1, 2 * M).astype(jnp.int32)

        out = _axis_mask(x, params, mask_axis=mask_axis,
                         fill_value=self.fill_value, max_num_masks=M)

        if ndim > 3:
            out = out.reshape(in_shape)
        return out, (start_pos, widths)   # params returned for reference check


def _reference(x, start_pos, widths, dim, fill_value):
    """Pure-JAX reference mirroring the PyTorch forward."""
    in_shape = x.shape
    ndim = x.ndim
    if ndim > 3:
        x = x.reshape(-1, in_shape[-2], in_shape[-1])
    L = x.shape[dim]
    sp = start_pos[:, :, None]
    w = widths[:, :, None]
    ref = jnp.arange(L).reshape(1, 1, -1)
    mask = ((sp <= ref) & (ref < sp + w)).any(axis=1)
    if dim == -1:
        mask = mask[:, None, :]
    else:
        mask = mask[:, :, None]
    out = jnp.where(mask, jnp.asarray(fill_value, x.dtype), x)
    if ndim > 3:
        out = out.reshape(in_shape)
    return out


if __name__ == "__main__":
    key = jax.random.PRNGKey(0)
    key_x, key_m1, key_m2, key_x3, key_m3 = jax.random.split(key, 5)

    # (batch, channels, time, freq) — freq=128 keeps the lane dim full-width
    # and > default max_width=30 (as a real spectrogram would be).
    x = jax.random.normal(key_x, (2, 4, 16, 128), dtype=jnp.float32)

    # --- freq masking (dim=-1), run under jit to prove traceability ---
    freq_masker = AxisMasker(min_width=0, max_width=30, min_num_masks=1,
                             max_num_masks=2, dim=-1, fill_value=0)
    y, (sp, wd) = jax.jit(lambda k, xx: freq_masker(k, xx, training=True))(
        key_m1, x)
    y = jax.block_until_ready(y)
    y_ref = _reference(x, sp, wd, dim=-1, fill_value=0)
    assert y.shape == x.shape and y.dtype == x.dtype
    assert jnp.allclose(y, y_ref), "freq-mask mismatch vs reference"

    # --- time masking (dim=-2), eager call ---
    time_masker = AxisMasker(min_width=0, max_width=8, min_num_masks=1,
                             max_num_masks=2, dim=-2, fill_value=0)
    z, (sp2, wd2) = time_masker(key_m2, x, training=True)
    z = jax.block_until_ready(z)
    z_ref = _reference(x, sp2, wd2, dim=-2, fill_value=0)
    assert z.shape == x.shape and z.dtype == x.dtype
    assert jnp.allclose(z, z_ref), "time-mask mismatch vs reference"

    # --- ragged batch (B=3, prime): exercises the cdiv grid / padded block ---
    x3 = jax.random.normal(key_x3, (3, 16, 128), dtype=jnp.float32)
    w3, (sp3, wd3) = freq_masker(key_m3, x3, training=True)
    w3 = jax.block_until_ready(w3)
    w3_ref = _reference(x3, sp3, wd3, dim=-1, fill_value=0)
    assert w3.shape == x3.shape and w3.dtype == x3.dtype
    assert jnp.allclose(w3, w3_ref), "ragged-batch freq-mask mismatch"

    # --- eval mode passthrough ---
    p, _ = (x, None) if (r := freq_masker(key_m1, x, training=False)) is None else r
    assert jnp.array_equal(p, x)

    print("KERNEL_OK")
</pallas_src>

<mosaic_0001>
module attributes {stable_mosaic.version = 11 : i64} {
  func.func @_axis_mask_kernel(%arg0: i32, %arg1: memref<4x1x4xi32, #tpu.memory_space<vmem>>, %arg2: memref<4x16x128xf32, #tpu.memory_space<vmem>>, %arg3: memref<4x16x128xf32, #tpu.memory_space<vmem>>) attributes {dimension_semantics = [#tpu.dimension_semantics<parallel>], iteration_bounds = array<i64: 2>, scalar_prefetch = 0 : i64, scratch_operands = 0 : i64, tpu.core_type = #tpu.core_type<tc>, window_params = [{transform_indices = @transform_0, window_bounds = array<i64: 4, 1, 4>}, {transform_indices = @transform_1, window_bounds = array<i64: 4, 16, 128>}, {transform_indices = @transform_2, window_bounds = array<i64: 4, 16, 128>}]} {
    %0 = tpu.iota {dimensions = array<i32: 2>} : vector<4x1x128xi32>
    %c0 = arith.constant 0 : index
    %c0_0 = arith.constant 0 : index
    %c0_1 = arith.constant 0 : index
    %1 = vector.load %arg1[%c0, %c0_0, %c0_1] : memref<4x1x4xi32, #tpu.memory_space<vmem>>, vector<4x1x4xi32>
    %false = arith.constant false
    %2 = vector.broadcast %false : i1 to vector<4x1x128xi1>
    %3 = vector.extract_strided_slice %1 {offsets = [0, 0, 0], sizes = [4, 1, 1], strides = [1, 1, 1]} : vector<4x1x4xi32> to vector<4x1x1xi32>
    %4 = vector.shape_cast %3 : vector<4x1x1xi32> to vector<4x1xi32>
    %5 = vector.shape_cast %4 : vector<4x1xi32> to vector<4x1x1xi32>
    %6 = vector.extract_strided_slice %1 {offsets = [0, 0, 2], sizes = [4, 1, 1], strides = [1, 1, 1]} : vector<4x1x4xi32> to vector<4x1x1xi32>
    %7 = vector.shape_cast %6 : vector<4x1x1xi32> to vector<4x1xi32>
    %8 = vector.shape_cast %7 : vector<4x1xi32> to vector<4x1x1xi32>
    %9 = vector.broadcast %5 : vector<4x1x1xi32> to vector<4x1x128xi32>
    %10 = arith.subi %0, %9 : vector<4x1x128xi32>
    %11 = vector.broadcast %8 : vector<4x1x1xi32> to vector<4x1x128xi32>
    %12 = arith.cmpi ult, %10, %11 : vector<4x1x128xi32>
    %13 = arith.ori %2, %12 : vector<4x1x128xi1>
    %14 = vector.extract_strided_slice %1 {offsets = [0, 0, 1], sizes = [4, 1, 1], strides = [1, 1, 1]} : vector<4x1x4xi32> to vector<4x1x1xi32>
    %15 = vector.shape_cast %14 : vector<4x1x1xi32> to vector<4x1xi32>
    %16 = vector.shape_cast %15 : vector<4x1xi32> to vector<4x1x1xi32>
    %17 = vector.extract_strided_slice %1 {offsets = [0, 0, 3], sizes = [4, 1, 1], strides = [1, 1, 1]} : vector<4x1x4xi32> to vector<4x1x1xi32>
    %18 = vector.shape_cast %17 : vector<4x1x1xi32> to vector<4x1xi32>
    %19 = vector.shape_cast %18 : vector<4x1xi32> to vector<4x1x1xi32>
    %20 = vector.broadcast %16 : vector<4x1x1xi32> to vector<4x1x128xi32>
    %21 = arith.subi %0, %20 : vector<4x1x128xi32>
    %22 = vector.broadcast %19 : vector<4x1x1xi32> to vector<4x1x128xi32>
    %23 = arith.cmpi ult, %21, %22 : vector<4x1x128xi32>
    %24 = arith.ori %13, %23 : vector<4x1x128xi1>
    %c0_2 = arith.constant 0 : index
    %c0_3 = arith.constant 0 : index
    %c0_4 = arith.constant 0 : index
    %25 = vector.load %arg2[%c0_2, %c0_3, %c0_4] : memref<4x16x128xf32, #tpu.memory_space<vmem>>, vector<4x16x128xf32>
    %cst = arith.constant 0.000000e+00 : f32
    %26 = vector.shape_cast %24 : vector<4x1x128xi1> to vector<4x1x128xi1>
    %27 = vector.broadcast %26 : vector<4x1x128xi1> to vector<4x16x128xi1>
    %28 = vector.broadcast %cst : f32 to vector<4x16x128xf32>
    %29 = arith.select %27, %28, %25 : vector<4x16x128xi1>, vector<4x16x128xf32>
    %c0_5 = arith.constant 0 : index
    %c0_6 = arith.constant 0 : index
    %c0_7 = arith.constant 0 : index
    %30 = vector.load %arg3[%c0_5, %c0_6, %c0_7] : memref<4x16x128xf32, #tpu.memory_space<vmem>>, vector<4x16x128xf32>
    tpu.vector_store %arg3[%c0_5, %c0_6, %c0_7], %29 {strides = array<i32>} : memref<4x16x128xf32, #tpu.memory_space<vmem>>, vector<4x16x128xf32>,
    return
  }
  func.func @transform_0(%arg0: i32) -> (i32, i32, i32) {
    %c0_i32 = arith.constant 0 : i32
    %c0_i32_0 = arith.constant 0 : i32
    %c0_i32_1 = arith.constant 0 : i32
    return %arg0, %c0_i32, %c0_i32_0 : i32, i32, i32
  }
  func.func @transform_1(%arg0: i32) -> (i32, i32, i32) {
    %c0_i32 = arith.constant 0 : i32
    %c0_i32_0 = arith.constant 0 : i32
    %c0_i32_1 = arith.constant 0 : i32
    return %arg0, %c0_i32, %c0_i32_0 : i32, i32, i32
  }
  func.func @transform_2(%arg0: i32) -> (i32, i32, i32) {
    %c0_i32 = arith.constant 0 : i32
    %c0_i32_0 = arith.constant 0 : i32
    %c0_i32_1 = arith.constant 0 : i32
    return %arg0, %c0_i32, %c0_i32_0 : i32, i32, i32
  }
}

</mosaic_0001>

<bundles_post_ra>
// kernel: _lambda_.1
= control target key start
LH: loop header
LB: loop body
LE: loop exit
PB: predicated region body
PF: predicated region fallthrough
CT: control target
= control target key end

     0   :  { %7 = vsyncpa [#allocation3], 0  ;;  %s703_s0 = inlined_call_operand.vmem [shape: s32[8,1,4], index: 0, kind: input, shape index: {}]   ;;  %s704_s1 = inlined_call_operand.vmem [shape: f32[8,16,128], index: 1, kind: input, shape index: {}]   ;;  %s705_s2 = inlined_call_operand.hbm [shape: f32[8,16,128], index: 2, kind: output, shape index: {}]  }
   0x1   :  { %9 = vsyncpa [#allocation3 + $0x1], 0  ;;  %s568_s9 = smov 0   ;;  %s570_s10 = smov 0  }
   0x2   :  { %s572_s11 = smov 0   ;;  %s574_s12 = smov 0  }
   0x3 LB: > { %s589_s13 = sadd.s32 4294967295, %s545_s12   ;;  %s393_s14 = sadd.s32 4294967294, %s545_s12   ;;  %s545_s12 = sphi %s574_s12, %s711_s12   ;;  %s541_s11 = sphi %s572_s11, %s710_s11   ;;  %s537_s10 = sphi %s570_s10, %s709_s10   ;;  %s533_s9 = sphi %s568_s9, %s708_s9  }
   0x4   : > { %s593_s15 = sadd.s32 1, %s545_s12   ;;  %s74_s16 = sadd.s32 1, %s541_s11 }
   0x5   : > { %s71_s17 = ssub.s32 %s545_s12, %s593_s15  ;;  %p84_p0 = scmp.ne.s32.totalorder %s541_s11, %s537_s10 }
   0x6   : > { %p72_p1 = scmp.eq.s32.totalorder %s71_s17, 0  ;;  %p85_p2 = scmp.eq.s32.totalorder %s589_s13, 1 }
   0x7   : > { %p90_p3 = scmp.ne.s32.totalorder %s537_s10, %s533_s9  ;;  %p91_p4 = scmp.eq.s32.totalorder %s393_s14, 1 }
   0x8   : > { %s604_s18 = scalar_select %p72_p1, %s541_s11, %s74_s16  }
   0x9   : > { %p606_p5 = por %p85_p2, %p84_p0  ;;  %p610_p6 = por %p91_p4, %p90_p3 }
   0xa   : > { %p396_p7 = scmp.ge.s32.totalorder %s545_s12, 1  ;;  %p127_p8 = scmp.lt.s32.totalorder %s545_s12, 3 }
   0xc   : > { %p128_p9 = pnand %p396_p7, %p127_p8 }
   0xd   : > { %s398_s21 = sshll.u32 (!%p128_p9), %s589_s13, 2  ;;  %s151_s26 = sand.u32 (!%p128_p9), 1, %s537_s10  }
   0xe   : > { %131 = sbr.rel (%p128_p9) target bundleno = 192 (0xc0), region = 28  ;;  %p155_p10 = scmp.lt.s32.totalorder (!%p128_p9), %s398_s21, 7 }
   0xf   : > { %s397_s30 = sshll.u32 (!%p128_p9), %s151_s26, 6  ;;  %s426_s4 = sshll.u32 (!%p128_p9), %s589_s13, 6 }
  0x10   : > { %s650_s3 = scalar_lea.vmem (!%p128_p9), [#allocation2], %s397_s30  ;;  %s318_s7 = scalar_lea.hbm (!%p128_p9), %s705_s2, %s426_s4 }
  0x11   : > { %s319_s8 = sshll.u32 (!%p128_p9), %s650_s3, 4  ;;  %s321_s13 = sshll.u32 (!%p128_p9), %s318_s7, 4  ;;  %s320_s8 = int_to_ptr.vmem [resolvable:$true] %s319_s8  ;;  %s322_s13 = int_to_ptr.hbm [resolvable:$true] %s321_s13 }
  0x12   : > { %s306_s14 = scalar_lea.sflag (!%p128_p9), [#allocation3], %s151_s26  ;;  %s497_s16 = sshra.s32 (!%p128_p9), %s322_s13, 4  ;;  %s498_s16 = int_to_ptr.hbm [resolvable:$true] %s497_s16 }
  0x13   : > { %v547_v0 = vmov 0   ;;  %v548_v1 = vmov 2   ;;  %s713_s21 = smov (!%p155_p10, %s398_s21), 7  ;;  %v549_v6 = vmov 1   ;;  %v550_v7 = vmov 3   ;;  %s499_s17 = scalar_lea.hbm %s498_s16, 64 }
  0x14   : > { %473 = vset.pattern.permute.xlu1 %v547_v0  ;;  %472 = vset.pattern.permute.xlu0 %v547_v0  ;;  %s157_s24 = scalar_lea.vmem %s703_s0, %s713_s21  ;;  %v167_v19 = vlaneseq  ;;  %s424_s25 = sshll.u32 %s713_s21, 4 }
  0x15   : > { %474 = vset.pattern.permute.xlu2 %v548_v1  ;;  %v171_v2 = vld [vmem:[%s157_s24 + $0x2] sm:$0x1]  ;;  %v169_v3 = vld [vmem:[%s157_s24] sm:$0x1]  ;;  %v172_v4 = vld [vmem:[%s157_s24 + $0x3] sm:$0x1]  ;;  %s638_s29 = scalar_lea.vmem %s704_s1, %s424_s25  ;;  %p500_p11 = scmp.ne.s32.totalorder %s498_s16, %s499_s17 }
  0x16   : > { %182 = vperm.xlu1 %473, %v171_v2   ;;  %174 = vperm.xlu0 %472, %v169_v3   ;;  %v170_v5 = vld [vmem:[%s157_s24 + $0x1] sm:$0x1]  ;;  %v629_v21 = vand.u32 127, %v167_v19  ;;  %v275_v48 = vld [vmem:[%s638_s29 + $0x10] sm:$0xff]  ;;  %v276_v49 = vld [vmem:[%s638_s29 + $0x18] sm:$0xff]  ;;  %s503_s23 = scalar_lea.hbm %s705_s2, 128  ;;  %p504_p0 = scmp.lt.s32.totalorder %s498_s16, %s705_s2 }
  0x17   : > { %194 = vperm.xlu2 %474, %v169_v3   ;;  %v279_v50 = vld [vmem:[%s638_s29 + $0x30] sm:$0xff]  ;;  %v280_v51 = vld [vmem:[%s638_s29 + $0x38] sm:$0xff]  ;;  %p501_p12 = pnand %p500_p11, %p606_p5  ;;  %p505_p1 = scmp.lt.s32.totalorder %s503_s23, %s499_s17 }
  0x19   : > { %p502_p13 = pneg %p501_p12  ;;  %p506_p2 = por %p505_p1, %p504_p0 }
  0x1b   : > { %p507_p3 = pnand %p506_p2, %p502_p13 }
  0x1e   : > { %186 = vperm.xlu1 %473, %v172_v4   ;;  %178 = vperm.xlu0 %472, %v170_v5  }
  0x1f   : > { %198 = vperm.xlu2 %474, %v170_v5  }
  0x26   : > { %476 = vset.pattern.permute.xlu1 %v548_v1  ;;  %475 = vset.pattern.permute.xlu0 %v548_v1  ;;  %v273_v1 = vld [vmem:[%s638_s29] sm:$0xff] }
  0x27   : > { %206 = vperm.xlu1 %476, %v172_v4   ;;  %202 = vperm.xlu0 %475, %v171_v2  }
  0x28   : > { %477 = vset.pattern.permute.xlu2 %v549_v6 }
  0x29   : > { %222 = vperm.xlu2 %477, %v169_v3  }
  0x2f   : > { %478 = vset.pattern.permute.xlu1 %v549_v6  ;;  %479 = vset.pattern.permute.xlu0 %v549_v6 }
  0x30   : > { %226 = vperm.xlu1 %478, %v170_v5   ;;  %234 = vperm.xlu0 %479, %v172_v4  }
  0x31   : > { %230 = vperm.xlu2 %477, %v171_v2  }
  0x38   : > { %480 = vset.pattern.permute.xlu1 %v550_v7  ;;  %482 = vset.pattern.permute.xlu0 %v550_v7 }
  0x39   : > { %242 = vperm.xlu1 %480, %v169_v3   ;;  %481 = vset.pattern.permute.xlu2 %v550_v7 }
  0x3a   : > { %246 = vperm.xlu2 %481, %v170_v5  }
  0x41   : > { %250 = vperm.xlu1 %480, %v171_v2   ;;  %v274_v2 = vld [vmem:[%s638_s29 + $0x8] sm:$0xff] }
  0x42   : > { %254 = vperm.xlu2 %481, %v172_v4  }
  0x71   : > { %v195_v8 = vpop.permute.xlu2 %194 }
  0x72   : > { %v196_v42 = vperm.slane %v195_v8, 0 }
  0x74   : > { %v403_v53 = vxor.u32 2147483648, %v196_v42 }
  0x79   : > { %v199_v9 = vpop.permute.xlu2 %198 }
  0x7a   : > { %v200_v30 = vperm.slane %v199_v9, 0 }
  0x7c   : > { %v405_v43 = vxor.u32 2147483648, %v200_v30 }
  0x83   : > { %v223_v10 = vpop.permute.xlu2 %222 }
  0x84   : > { %v224_v40 = vperm.slane %v223_v10, 0 }
  0x86   : > { %v237_v52 = vsub.s32 %v629_v21, %v224_v40 }
  0x88   : > { %v623_v11 = vpop.permute.xlu1 %182  ;;  %v175_v12 = vpop.permute.xlu0 %174  ;;  %v410_v62 = vxor.u32 2147483648, %v237_v52 }
  0x89   : > { %v176_v33 = vperm.slane %v175_v12, 0  ;;  %v184_v61 = vperm.slane %v623_v11, 0 }
  0x8b   : > { %v625_v13 = vpop.permute.xlu2 %230  ;;  %v189_v46 = vsub.s32 %v629_v21, %v176_v33  ;;  %v191_v4 = vsub.s32 %v629_v21, %v184_v61 }
  0x8c   : > { %v232_v63 = vperm.slane %v625_v13, 0 }
  0x8d   : > { %v402_v57 = vxor.u32 2147483648, %v189_v46  ;;  %v406_v11 = vxor.u32 2147483648, %v191_v4 }
  0x8e   : > { %v239_v5 = vsub.s32 %v629_v21, %v232_v63 }
  0x8f   : > { %vm211_vm6 = vcmp.lt.s32.totalorder %v402_v57, %v403_v53 }
  0x90   : > { %v187_v14 = vpop.permute.xlu1 %186  ;;  %v179_v15 = vpop.permute.xlu0 %178  ;;  %v414_v12 = vxor.u32 2147483648, %v239_v5 }
  0x91   : > { %v180_v20 = vperm.slane %v179_v15, 0  ;;  %v188_v23 = vperm.slane %v187_v14, 0  ;;  %v277_v14 = vld [vmem:[%s638_s29 + $0x20] sm:$0xff]  ;;  %v278_v15 = vld [vmem:[%s638_s29 + $0x28] sm:$0xff] }
  0x93   : > { %v190_v24 = vsub.s32 %v629_v21, %v180_v20  ;;  %v192_v34 = vsub.s32 %v629_v21, %v188_v23 }
  0x94   : > { %v247_v16 = vpop.permute.xlu2 %246 }
  0x95   : > { %v248_v25 = vperm.slane %v247_v16, 0  ;;  %v404_v35 = vxor.u32 2147483648, %v190_v24  ;;  %v408_v47 = vxor.u32 2147483648, %v192_v34 }
  0x97   : > { %v413_v36 = vxor.u32 2147483648, %v248_v25  ;;  %vm214_vm0 = vcmp.lt.s32.totalorder %v404_v35, %v405_v43 }
  0x99   : > { %v207_v17 = vpop.permute.xlu1 %206  ;;  %v627_v18 = vpop.permute.xlu0 %202 }
  0x9a   : > { %v208_v27 = vperm.slane %v207_v17, 0  ;;  %v204_v3 = vperm.slane %v627_v18, 0 }
  0x9c   : > { %v255_v22 = vpop.permute.xlu2 %254  ;;  %v409_v41 = vxor.u32 2147483648, %v208_v27  ;;  %v407_v9 = vxor.u32 2147483648, %v204_v3 }
  0x9d   : > { %v256_v26 = vperm.slane %v255_v22, 0 }
  0x9e   : > { %vm220_vm3 = vcmp.lt.s32.totalorder %v408_v47, %v409_v41  ;;  %vm217_vm9 = vcmp.lt.s32.totalorder %v406_v11, %v407_v9 }
  0x9f   : > { %v417_v39 = vxor.u32 2147483648, %v256_v26 }
  0xa2   : > { %v227_v28 = vpop.permute.xlu1 %226  ;;  %v235_v29 = vpop.permute.xlu0 %234 }
  0xa3   : > { %v228_v31 = vperm.slane %v227_v28, 0  ;;  %v236_v32 = vperm.slane %v235_v29, 0 }
  0xa5   : > { %v238_v37 = vsub.s32 %v629_v21, %v228_v31  ;;  %v240_v38 = vsub.s32 %v629_v21, %v236_v32 }
  0xa7   : > { %v412_v44 = vxor.u32 2147483648, %v238_v37  ;;  %v416_v45 = vxor.u32 2147483648, %v240_v38 }
  0xa9   : > { %vm262_vm1 = vcmp.lt.s32.totalorder %v412_v44, %v413_v36  ;;  %vm268_vm2 = vcmp.lt.s32.totalorder %v416_v45, %v417_v39 }
  0xaa   : > { %vm270_vm4 = vmor %vm214_vm0, %vm262_vm1 }
  0xab   : > { %v291_v54 = vsel %vm270_vm4, 0.0, %v275_v48  ;;  %v292_v55 = vsel %vm270_vm4, 0.0, %v276_v49  ;;  %vm272_vm5 = vmor %vm220_vm3, %vm268_vm2  ;;  %v243_v56 = vpop.permute.xlu1 %242 }
  0xac   : > { %299 = vst [vmem:[%s650_s3 + $0x10] sm:$0xff] %v291_v54  ;;  %v295_v58 = vsel %vm272_vm5, 0.0, %v279_v50  ;;  %v296_v59 = vsel %vm272_vm5, 0.0, %v280_v51  ;;  %v244_v60 = vperm.slane %v243_v56, 0 }
  0xad   : > { %300 = vst [vmem:[%s650_s3 + $0x18] sm:$0xff] %v292_v55 }
  0xae   : > { %303 = vst [vmem:[%s650_s3 + $0x30] sm:$0xff] %v295_v58  ;;  %v411_v0 = vxor.u32 2147483648, %v244_v60 }
  0xaf   : > { %304 = vst [vmem:[%s650_s3 + $0x38] sm:$0xff] %v296_v59 }
  0xb0   : > { %vm259_vm7 = vcmp.lt.s32.totalorder %v410_v62, %v411_v0 }
  0xb1   : > { %vm269_vm8 = vmor %vm211_vm6, %vm259_vm7 }
  0xb2   : > { %v289_v6 = vsel %vm269_vm8, 0.0, %v273_v1  ;;  %v290_v7 = vsel %vm269_vm8, 0.0, %v274_v2 }
  0xb3   : > { %297 = vst [vmem:[%s650_s3] sm:$0xff] %v289_v6  ;;  %v251_v8 = vpop.permute.xlu1 %250 }
  0xb4   : > { %298 = vst [vmem:[%s650_s3 + $0x8] sm:$0xff] %v290_v7  ;;  %v252_v10 = vperm.slane %v251_v8, 0 }
  0xb6   : > { %v415_v13 = vxor.u32 2147483648, %v252_v10 }
  0xb8   : > { %vm265_vm10 = vcmp.lt.s32.totalorder %v414_v12, %v415_v13 }
  0xb9   : > { %vm271_vm11 = vmor %vm217_vm9, %vm265_vm10 }
  0xba   : > { %v293_v16 = vsel %vm271_vm11, 0.0, %v277_v14  ;;  %v294_v17 = vsel %vm271_vm11, 0.0, %v278_v15 }
  0xbb   : > { %301 = vst [vmem:[%s650_s3 + $0x20] sm:$0xff] %v293_v16 }
  0xbc   : > { %302 = vst [vmem:[%s650_s3 + $0x28] sm:$0xff] %v294_v17 }
  0xbd   : > { %510 = shalt.err (!%p507_p3)
}
  0xbe   : > { %s551_s26 = smov 128   ;;  %s552_s27 = smov 8  }
  0xbf   : > { %427 = dma.vmem_to_hbm [thread:$0]  (%p606_p5), %s320_s8, 1024, %s322_s13, %s306_s14, %s551_s26, %s551_s26, %s552_s27  }
  0xc0 PF: > { %p433_p4 = scmp.ge.s32.totalorder %s545_s12, 2  ;;  %s336_s28 = sand.u32 1, %s533_s9  }
  0xc1   : > { %s337_s29 = scalar_lea.sflag [#allocation3], %s336_s28 }
  0xc2   : > { %p430_p7 = pnand %p433_p4, %p610_p6 }
  0xc4   : > { %p431_p8 = pneg %p430_p7 }
  0xc6   : > { %528 = dma.done.wait (%p431_p8), %s337_s29, 1024  }
  0xc7   : > { %530 = vsyncadd (%p431_p8), %s337_s29, 4294966272  ;;  %p12_p9 = scmp.ge.s32.totalorder %s593_s15, 4   ;;  %s708_s9 = smov %s537_s10 }
  0xc8   : > { %s709_s10 = smov %s541_s11  ;;  %s710_s11 = smov %s604_s18 }
  0xc9   : > { %s711_s12 = smov %s593_s15  ;;  %14 = sbr.rel (!%p12_p9) target bundleno = 3 (0x3), region = 66 }
  0xce   :  { %343 = vsyncpa [#allocation3], 1 }
  0xcf   :  { %345 = vsyncpa [#allocation3 + $0x1], 1 }

</bundles_post_ra>
